<compile_context>
chip_gen: v7x
topology: tpu7x:2x2x1
jax: 0.10.0
libtpu: 0.0.40
codegen_flags: <defaults>
</compile_context>

<pallas_src>
import math
from functools import partial

import jax
import jax.numpy as jnp
import numpy as np
from jax.experimental import pallas as pl
from jax.experimental.pallas import tpu as pltpu


def _round_up(x, m):
    return (x + m - 1) // m * m


# ----------------------------------------------------------------------------
# Kernel 1: fused get_affinity + readout + concat-with-qv (online softmax)
# ----------------------------------------------------------------------------
def _memory_read_kernel(mk_ref, qk_ref, mv_ref, qv_ref, out_ref,
                        m_i, l_i, acc):
    # mk_ref : (CKa, TN) bf16  augmented memory keys  [2*mk ; a_sq ; 0..]
    # qk_ref : (CKa, TM) bf16  augmented query keys   [qk ; -1 ; 0..]/sqrt(CK)
    # mv_ref : (CV,  TN) bf16  memory values
    # qv_ref : (CV,  TM) f32   query values (pass-through into the concat slab)
    # out_ref: (2CV, TM) f32   [mem ; qv]
    # scratch: m_i (1, TM) running max, l_i (1, TM) running sum, acc (CV, TM)
    k = pl.program_id(2)

    @pl.when(k == 0)
    def _():
        m_i[...] = jnp.full_like(m_i, -jnp.inf)
        l_i[...] = jnp.zeros_like(l_i)
        acc[...] = jnp.zeros_like(acc)

    # affinity tile straight off the MXU: (TN, TM), f32 accumulation.
    s = jax.lax.dot_general(
        mk_ref[...], qk_ref[...],
        dimension_numbers=(((0,), (0,)), ((), ())),
        preferred_element_type=jnp.float32)

    m_prev = m_i[...]                                               # (1, TM)
    m_new = jnp.maximum(m_prev, jnp.max(s, axis=0, keepdims=True))  # (1, TM)
    alpha = jnp.exp(m_prev - m_new)                                 # (1, TM)
    p = jnp.exp(s - m_new)                                          # (TN, TM)

    l_i[...] = alpha * l_i[...] + jnp.sum(p, axis=0, keepdims=True)
    acc[...] = alpha * acc[...] + jnp.dot(
        mv_ref[...], p.astype(mv_ref.dtype),
        preferred_element_type=jnp.float32)
    m_i[...] = m_new

    @pl.when(k == pl.num_programs(2) - 1)
    def _():
        cv = acc.shape[0]
        inv_l = pl.reciprocal(l_i[...], approx=True)                # (1, TM)
        out_ref[pl.ds(0, cv), :] = (acc[...] * inv_l).astype(out_ref.dtype)
        out_ref[pl.ds(cv, cv), :] = qv_ref[...].astype(out_ref.dtype)


@partial(jax.jit, static_argnames=("tn", "tm"))
def memory_readout(mk, qk, mv, qv, *, tn=512, tm=512):
    """MemoryReader.get_affinity + readout + cat([mem, qv], dim=1).

    mk: (B, CK, T, H, W)   qk: (B, CK, H, W)
    mv: (B, CV, T, H, W)   qv: (B, CV, H, W)
    returns mem_out: (B, 2*CV, H, W) float32
    """
    B, CK, T, H, W = mk.shape
    CV = mv.shape[1]
    N = T * H * W
    M = H * W

    # lane-dense padding (multiples of 128) + tile choice
    tm = min(_round_up(tm, 128), _round_up(M, 128))
    tn = min(_round_up(tn, 128), _round_up(N, 128))
    Mpad = _round_up(M, tm)
    Npad = _round_up(N, tn)

    inv_sqrt_ck = 1.0 / math.sqrt(CK)
    CKa = _round_up(CK + 1, 8)        # augmented (bias) channel, padded to x8

    mk_f = mk.reshape(B, CK, N).astype(jnp.float32)
    qk_f = qk.reshape(B, CK, M).astype(jnp.float32)
    a_sq = jnp.sum(mk_f * mk_f, axis=1, keepdims=True)              # (B, 1, N)

    # mk' = [2*mk ; a_sq ; 0],   qk' = [qk ; -1 ; 0] / sqrt(CK)
    #   =>  mk'^T @ qk' = (2*mk^T qk - a_sq)/sqrt(CK) = affinity logits.
    # Padded memory slots get bias +1e9 -> logits <= -1e9/sqrt(CK) -> weight 0.
    mk_aug = jnp.concatenate([2.0 * mk_f, a_sq], axis=1)            # (B, CK+1, N)
    mk_aug = jnp.pad(mk_aug, ((0, 0), (0, CKa - CK - 1), (0, Npad - N)))
    if Npad > N:
        mk_aug = mk_aug.at[:, CK, N:].set(1e9)
    mk_aug = mk_aug.astype(jnp.bfloat16)

    qk_aug = jnp.concatenate(
        [qk_f, jnp.full((B, 1, M), -1.0, jnp.float32)], axis=1) * inv_sqrt_ck
    qk_aug = jnp.pad(qk_aug, ((0, 0), (0, CKa - CK - 1), (0, Mpad - M)))
    qk_aug = qk_aug.astype(jnp.bfloat16)

    mv_p = jnp.pad(mv.reshape(B, CV, N).astype(jnp.bfloat16),
                   ((0, 0), (0, 0), (0, Npad - N)))
    qv_p = jnp.pad(qv.reshape(B, CV, M).astype(jnp.float32),
                   ((0, 0), (0, 0), (0, Mpad - M)))

    grid = (B, Mpad // tm, Npad // tn)   # N (reduction) axis last / innermost

    out = pl.pallas_call(
        _memory_read_kernel,
        out_shape=jax.ShapeDtypeStruct((B, 2 * CV, Mpad), jnp.float32),
        grid_spec=pltpu.PrefetchScalarGridSpec(
            num_scalar_prefetch=0,
            grid=grid,
            in_specs=[
                pl.BlockSpec((None, CKa, tn), lambda b, j, k: (b, 0, k)),
                pl.BlockSpec((None, CKa, tm), lambda b, j, k: (b, 0, j)),
                pl.BlockSpec((None, CV, tn), lambda b, j, k: (b, 0, k)),
                pl.BlockSpec((None, CV, tm), lambda b, j, k: (b, 0, j)),
            ],
            out_specs=pl.BlockSpec((None, 2 * CV, tm), lambda b, j, k: (b, 0, j)),
            scratch_shapes=[
                pltpu.VMEM((1, tm), jnp.float32),    # running max
                pltpu.VMEM((1, tm), jnp.float32),    # running sum
                pltpu.VMEM((CV, tm), jnp.float32),   # running mv @ p
            ],
        ),
        compiler_params=pltpu.CompilerParams(
            dimension_semantics=("parallel", "parallel", "arbitrary"),
            vmem_limit_bytes=48 * 1024 * 1024),      # headroom on v7x 64 MiB VMEM
    )(mk_aug, qk_aug, mv_p, qv_p)

    return out[:, :, :M].reshape(B, 2 * CV, H, W)


# ----------------------------------------------------------------------------
# Kernel 2: STCN.aggregate + softmax(logits, dim=1)[:, 1:]
# ----------------------------------------------------------------------------
def _aggregate_kernel(prob_ref, logits_ref, probout_ref):
    # prob_ref:   (B, K,   TS)   per-object probabilities
    # logits_ref: (B, K+1, TS)   aggregated logits (bg + objects)
    # probout_ref:(B, K,   TS)   softmax(logits)[:, 1:]
    K = prob_ref.shape[1]
    p = prob_ref[...].astype(jnp.float32)

    one_minus = 1.0 - p
    bg = one_minus[:, 0:1, :]
    for i in range(1, K):                    # K (num objects) is tiny: unrolled
        bg = bg * one_minus[:, i:i + 1, :]

    bg = jnp.clip(bg, 1e-7, 1.0 - 1e-7)
    pc = jnp.clip(p, 1e-7, 1.0 - 1e-7)
    logit_bg = jnp.log(bg) - jnp.log(1.0 - bg)           # (B, 1, TS)
    logit_fg = jnp.log(pc) - jnp.log(1.0 - pc)           # (B, K, TS)

    # write the two channel ranges directly (no in-kernel concatenate)
    logits_ref[:, pl.ds(0, 1), :] = logit_bg.astype(logits_ref.dtype)
    logits_ref[:, pl.ds(1, K), :] = logit_fg.astype(logits_ref.dtype)

    m = jnp.maximum(jnp.max(logit_fg, axis=1, keepdims=True), logit_bg)
    e_bg = jnp.exp(logit_bg - m)
    e_fg = jnp.exp(logit_fg - m)
    denom = e_bg + jnp.sum(e_fg, axis=1, keepdims=True)
    probout_ref[...] = (e_fg * pl.reciprocal(denom, approx=False)
                        ).astype(probout_ref.dtype)


@partial(jax.jit, static_argnames=("ts",))
def aggregate_and_softmax(prob, *, ts=2048):
    """prob: (B, K, H, W) -> (logits (B, K+1, H, W), prob_out (B, K, H, W))."""
    B, K, H, W = prob.shape
    S = H * W
    ts = min(_round_up(ts, 128), _round_up(S, 128))
    Spad = _round_up(S, ts)

    prob_p = jnp.pad(prob.reshape(B, K, S).astype(jnp.float32),
                     ((0, 0), (0, 0), (0, Spad - S)))

    logits, prob_out = pl.pallas_call(
        _aggregate_kernel,
        out_shape=(
            jax.ShapeDtypeStruct((B, K + 1, Spad), jnp.float32),
            jax.ShapeDtypeStruct((B, K, Spad), jnp.float32),
        ),
        grid_spec=pltpu.PrefetchScalarGridSpec(
            num_scalar_prefetch=0,
            grid=(Spad // ts,),
            in_specs=[pl.BlockSpec((B, K, ts), lambda s: (0, 0, s))],
            out_specs=(
                pl.BlockSpec((B, K + 1, ts), lambda s: (0, 0, s)),
                pl.BlockSpec((B, K, ts), lambda s: (0, 0, s)),
            ),
        ),
        compiler_params=pltpu.CompilerParams(
            dimension_semantics=("parallel",)),
    )(prob_p)

    return (logits[:, :, :S].reshape(B, K + 1, H, W),
            prob_out[:, :, :S].reshape(B, K, H, W))


# ----------------------------------------------------------------------------
# Pure-JAX references for validation (match the torch fp32 math)
# ----------------------------------------------------------------------------
def _memory_readout_ref(mk, qk, mv, qv):
    B, CK, T, H, W = mk.shape
    CV = mv.shape[1]
    mkf = mk.reshape(B, CK, -1).astype(jnp.float32)
    qkf = qk.reshape(B, CK, -1).astype(jnp.float32)
    a_sq = jnp.sum(mkf ** 2, axis=1)[:, :, None]
    ab = jnp.einsum("bcn,bcm->bnm", mkf, qkf)
    aff = (2 * ab - a_sq) / math.sqrt(CK)
    aff = jax.nn.softmax(aff, axis=1)
    mem = jnp.einsum("bcn,bnm->bcm",
                     mv.reshape(B, CV, -1).astype(jnp.float32), aff)
    return jnp.concatenate([mem.reshape(B, CV, H, W),
                            qv.astype(jnp.float32)], axis=1)


def _aggregate_ref(prob):
    bg = jnp.prod(1 - prob, axis=1, keepdims=True)
    new_prob = jnp.clip(jnp.concatenate([bg, prob], axis=1), 1e-7, 1 - 1e-7)
    logits = jnp.log(new_prob / (1 - new_prob))
    return logits, jax.nn.softmax(logits, axis=1)[:, 1:]


# ----------------------------------------------------------------------------
if __name__ == "__main__":
    key = jax.random.PRNGKey(0)
    k1, k2, k3, k4, k5 = jax.random.split(key, 5)

    # Small shapes consistent with STCN.segment / MemoryReader.
    # H*W = 192 and N = T*H*W = 576 are NOT multiples of 128 -> exercises lane
    # padding + masked padded-memory slots; tn=tm=128 -> multiple online-softmax
    # steps and multiple M tiles.
    B, CK, CV, T, H, W = 2, 16, 32, 3, 16, 12

    def bf16ify(x):
        # test data is made exactly bf16-representable so the f32 reference
        # sees the same values the bf16 MXU path sees
        return x.astype(jnp.bfloat16).astype(jnp.float32)

    mk = bf16ify(jax.random.normal(k1, (B, CK, T, H, W), jnp.float32))  # memory keys
    qk = bf16ify(jax.random.normal(k2, (B, CK, H, W), jnp.float32))     # query keys
    mv = bf16ify(jax.random.normal(k3, (B, CV, T, H, W), jnp.float32))  # memory values
    qv = bf16ify(jax.random.normal(k4, (B, CV, H, W), jnp.float32))     # query values

    mem_out = jax.block_until_ready(memory_readout(mk, qk, mv, qv, tn=128, tm=128))
    mem_ref = _memory_readout_ref(mk, qk, mv, qv)
    # bf16 MXU path -> flash-attention-style tolerance
    np.testing.assert_allclose(np.asarray(mem_out), np.asarray(mem_ref),
                               rtol=5e-2, atol=5e-2)

    # Aggregate stage (decoder CNN itself is TODO; feed synthetic per-object probs).
    K_obj, Hd, Wd = 2, 16, 12
    prob = jax.nn.sigmoid(jax.random.normal(k5, (B, K_obj, Hd, Wd), jnp.float32))
    logits, prob_out = aggregate_and_softmax(prob, ts=128)
    logits = jax.block_until_ready(logits)
    prob_out = jax.block_until_ready(prob_out)
    logits_ref, prob_out_ref = _aggregate_ref(prob)
    np.testing.assert_allclose(np.asarray(logits), np.asarray(logits_ref),
                               rtol=1e-4, atol=1e-4)
    np.testing.assert_allclose(np.asarray(prob_out), np.asarray(prob_out_ref),
                               rtol=1e-4, atol=1e-4)

    print("KERNEL_OK")
</pallas_src>

<mosaic_0001>
module attributes {stable_mosaic.version = 11 : i64} {
  func.func @_memory_read_kernel(%arg0: i32, %arg1: i32, %arg2: i32, %arg3: memref<1x24x128xbf16, #tpu.memory_space<vmem>>, %arg4: memref<1x24x128xbf16, #tpu.memory_space<vmem>>, %arg5: memref<1x32x128xbf16, #tpu.memory_space<vmem>>, %arg6: memref<1x32x128xf32, #tpu.memory_space<vmem>>, %arg7: memref<1x64x128xf32, #tpu.memory_space<vmem>>, %arg8: memref<1x128xf32, #tpu.memory_space<vmem>>, %arg9: memref<1x128xf32, #tpu.memory_space<vmem>>, %arg10: memref<32x128xf32, #tpu.memory_space<vmem>>) attributes {dimension_semantics = [#tpu.dimension_semantics<parallel>, #tpu.dimension_semantics<parallel>, #tpu.dimension_semantics<arbitrary>], iteration_bounds = array<i64: 2, 2, 5>, scalar_prefetch = 0 : i64, scratch_operands = 3 : i64, tpu.core_type = #tpu.core_type<tc>, window_params = [{transform_indices = @transform_0, window_bounds = array<i64: 1, 24, 128>}, {transform_indices = @transform_1, window_bounds = array<i64: 1, 24, 128>}, {transform_indices = @transform_2, window_bounds = array<i64: 1, 32, 128>}, {transform_indices = @transform_3, window_bounds = array<i64: 1, 32, 128>}, {transform_indices = @transform_4, window_bounds = array<i64: 1, 64, 128>}]} {
    %c0_i32 = arith.constant 0 : i32
    %0 = arith.cmpi eq, %arg2, %c0_i32 : i32
    %1 = arith.extui %0 : i1 to i32
    %c0_i32_0 = arith.constant 0 : i32
    %2 = arith.cmpi ne, %1, %c0_i32_0 : i32
    scf.if %2 {
      %cst_25 = arith.constant 0xFF800000 : f32
      %36 = vector.broadcast %cst_25 : f32 to vector<1x128xf32>
      %c0_26 = arith.constant 0 : index
      %c0_27 = arith.constant 0 : index
      %37 = vector.load %arg8[%c0_26, %c0_27] : memref<1x128xf32, #tpu.memory_space<vmem>>, vector<1x128xf32>
      tpu.vector_store %arg8[%c0_26, %c0_27], %36 {strides = array<i32>} : memref<1x128xf32, #tpu.memory_space<vmem>>, vector<1x128xf32>,
      %cst_28 = arith.constant 0.000000e+00 : f32
      %38 = vector.broadcast %cst_28 : f32 to vector<1x128xf32>
      %c0_29 = arith.constant 0 : index
      %c0_30 = arith.constant 0 : index
      %39 = vector.load %arg9[%c0_29, %c0_30] : memref<1x128xf32, #tpu.memory_space<vmem>>, vector<1x128xf32>
      tpu.vector_store %arg9[%c0_29, %c0_30], %38 {strides = array<i32>} : memref<1x128xf32, #tpu.memory_space<vmem>>, vector<1x128xf32>,
      %cst_31 = arith.constant 0.000000e+00 : f32
      %40 = vector.broadcast %cst_31 : f32 to vector<32x128xf32>
      %c0_32 = arith.constant 0 : index
      %c0_33 = arith.constant 0 : index
      %41 = vector.load %arg10[%c0_32, %c0_33] : memref<32x128xf32, #tpu.memory_space<vmem>>, vector<32x128xf32>
      tpu.vector_store %arg10[%c0_32, %c0_33], %40 {strides = array<i32>} : memref<32x128xf32, #tpu.memory_space<vmem>>, vector<32x128xf32>,
    } else {
    }
    %c0 = arith.constant 0 : index
    %c0_1 = arith.constant 0 : index
    %c0_2 = arith.constant 0 : index
    %3 = vector.load %arg3[%c0, %c0_1, %c0_2] : memref<1x24x128xbf16, #tpu.memory_space<vmem>>, vector<1x24x128xbf16>
    %4 = vector.shape_cast %3 : vector<1x24x128xbf16> to vector<24x128xbf16>
    %c0_3 = arith.constant 0 : index
    %c0_4 = arith.constant 0 : index
    %c0_5 = arith.constant 0 : index
    %5 = vector.load %arg4[%c0_3, %c0_4, %c0_5] : memref<1x24x128xbf16, #tpu.memory_space<vmem>>, vector<1x24x128xbf16>
    %6 = vector.shape_cast %5 : vector<1x24x128xbf16> to vector<24x128xbf16>
    %cst = arith.constant dense<0.000000e+00> : vector<128x128xf32>
    %7 = tpu.matmul %4, %6, %cst {dimension_numbers = #tpu.dot_dimension_numbers<[0], [0], [1], [1], [0, 1, 1, 1], [], []>} : vector<24x128xbf16>, vector<24x128xbf16>, vector<128x128xf32> -> vector<128x128xf32>
    %c0_6 = arith.constant 0 : index
    %c0_7 = arith.constant 0 : index
    %8 = vector.load %arg8[%c0_6, %c0_7] : memref<1x128xf32, #tpu.memory_space<vmem>>, vector<1x128xf32>
    %cst_8 = arith.constant dense<0xFF800000> : vector<128xf32>
    %9 = vector.multi_reduction <maximumf>, %7, %cst_8 [0] : vector<128x128xf32> to vector<128xf32>
    %10 = vector.shape_cast %9 : vector<128xf32> to vector<1x128xf32>
    %11 = arith.maximumf %8, %10 : vector<1x128xf32>
    %12 = arith.subf %8, %11 : vector<1x128xf32>
    %13 = math.exp %12 : vector<1x128xf32>
    %14 = vector.broadcast %11 : vector<1x128xf32> to vector<128x128xf32>
    %15 = arith.subf %7, %14 : vector<128x128xf32>
    %16 = math.exp %15 : vector<128x128xf32>
    %c0_9 = arith.constant 0 : index
    %c0_10 = arith.constant 0 : index
    %17 = vector.load %arg9[%c0_9, %c0_10] : memref<1x128xf32, #tpu.memory_space<vmem>>, vector<1x128xf32>
    %18 = arith.mulf %13, %17 : vector<1x128xf32>
    %cst_11 = arith.constant dense<0.000000e+00> : vector<128xf32>
    %19 = vector.multi_reduction <add>, %16, %cst_11 [0] : vector<128x128xf32> to vector<128xf32>
    %20 = vector.shape_cast %19 : vector<128xf32> to vector<1x128xf32>
    %21 = arith.addf %18, %20 : vector<1x128xf32>
    %c0_12 = arith.constant 0 : index
    %c0_13 = arith.constant 0 : index
    %22 = vector.load %arg9[%c0_12, %c0_13] : memref<1x128xf32, #tpu.memory_space<vmem>>, vector<1x128xf32>
    tpu.vector_store %arg9[%c0_12, %c0_13], %21 {strides = array<i32>} : memref<1x128xf32, #tpu.memory_space<vmem>>, vector<1x128xf32>,
    %c0_14 = arith.constant 0 : index
    %c0_15 = arith.constant 0 : index
    %23 = vector.load %arg10[%c0_14, %c0_15] : memref<32x128xf32, #tpu.memory_space<vmem>>, vector<32x128xf32>
    %24 = vector.broadcast %13 : vector<1x128xf32> to vector<32x128xf32>
    %25 = arith.mulf %24, %23 : vector<32x128xf32>
    %c0_16 = arith.constant 0 : index
    %c0_17 = arith.constant 0 : index
    %c0_18 = arith.constant 0 : index
    %26 = vector.load %arg5[%c0_16, %c0_17, %c0_18] : memref<1x32x128xbf16, #tpu.memory_space<vmem>>, vector<1x32x128xbf16>
    %27 = vector.shape_cast %26 : vector<1x32x128xbf16> to vector<32x128xbf16>
    %28 = arith.truncf %16 : vector<128x128xf32> to vector<128x128xbf16>
    %cst_19 = arith.constant dense<0.000000e+00> : vector<32x128xf32>
    %29 = tpu.matmul %27, %28, %cst_19 {dimension_numbers = #tpu.dot_dimension_numbers<[1], [0], [0], [1], [0, 0, 1, 1], [], []>} : vector<32x128xbf16>, vector<128x128xbf16>, vector<32x128xf32> -> vector<32x128xf32>
    %30 = arith.addf %25, %29 : vector<32x128xf32>
    %c0_20 = arith.constant 0 : index
    %c0_21 = arith.constant 0 : index
    %31 = vector.load %arg10[%c0_20, %c0_21] : memref<32x128xf32, #tpu.memory_space<vmem>>, vector<32x128xf32>
    tpu.vector_store %arg10[%c0_20, %c0_21], %30 {strides = array<i32>} : memref<32x128xf32, #tpu.memory_space<vmem>>, vector<32x128xf32>,
    %c0_22 = arith.constant 0 : index
    %c0_23 = arith.constant 0 : index
    %32 = vector.load %arg8[%c0_22, %c0_23] : memref<1x128xf32, #tpu.memory_space<vmem>>, vector<1x128xf32>
    tpu.vector_store %arg8[%c0_22, %c0_23], %11 {strides = array<i32>} : memref<1x128xf32, #tpu.memory_space<vmem>>, vector<1x128xf32>,
    %c4_i32 = arith.constant 4 : i32
    %33 = arith.cmpi eq, %arg2, %c4_i32 : i32
    %34 = arith.extui %33 : i1 to i32
    %c0_i32_24 = arith.constant 0 : i32
    %35 = arith.cmpi ne, %34, %c0_i32_24 : i32
    scf.if %35 {
      %c0_25 = arith.constant 0 : index
      %c0_26 = arith.constant 0 : index
      %36 = vector.load %arg9[%c0_25, %c0_26] : memref<1x128xf32, #tpu.memory_space<vmem>>, vector<1x128xf32>
      %37 = tpu.reciprocal %36 {approx = true} : vector<1x128xf32> -> vector<1x128xf32>
      %c0_27 = arith.constant 0 : index
      %c0_28 = arith.constant 0 : index
      %38 = vector.load %arg10[%c0_27, %c0_28] : memref<32x128xf32, #tpu.memory_space<vmem>>, vector<32x128xf32>
      %39 = vector.broadcast %37 : vector<1x128xf32> to vector<32x128xf32>
      %40 = arith.mulf %38, %39 : vector<32x128xf32>
      %c0_29 = arith.constant 0 : index
      %c0_30 = arith.constant 0 : index
      %c0_31 = arith.constant 0 : index
      %41 = vector.load %arg7[%c0_29, %c0_30, %c0_31] : memref<1x64x128xf32, #tpu.memory_space<vmem>>, vector<1x32x128xf32>
      %42 = vector.shape_cast %41 : vector<1x32x128xf32> to vector<32x128xf32>
      %43 = vector.shape_cast %40 : vector<32x128xf32> to vector<1x32x128xf32>
      tpu.vector_store %arg7[%c0_29, %c0_30, %c0_31], %43 {strides = array<i32>} : memref<1x64x128xf32, #tpu.memory_space<vmem>>, vector<1x32x128xf32>,
      %c0_32 = arith.constant 0 : index
      %c0_33 = arith.constant 0 : index
      %c0_34 = arith.constant 0 : index
      %44 = vector.load %arg6[%c0_32, %c0_33, %c0_34] : memref<1x32x128xf32, #tpu.memory_space<vmem>>, vector<1x32x128xf32>
      %45 = vector.shape_cast %44 : vector<1x32x128xf32> to vector<32x128xf32>
      %c0_35 = arith.constant 0 : index
      %c32 = arith.constant 32 : index
      %c0_36 = arith.constant 0 : index
      %46 = vector.load %arg7[%c0_35, %c32, %c0_36] : memref<1x64x128xf32, #tpu.memory_space<vmem>>, vector<1x32x128xf32>
      %47 = vector.shape_cast %46 : vector<1x32x128xf32> to vector<32x128xf32>
      %48 = vector.shape_cast %45 : vector<32x128xf32> to vector<1x32x128xf32>
      tpu.vector_store %arg7[%c0_35, %c32, %c0_36], %48 {strides = array<i32>} : memref<1x64x128xf32, #tpu.memory_space<vmem>>, vector<1x32x128xf32>,
    } else {
    }
    return
  }
  func.func @transform_0(%arg0: i32, %arg1: i32, %arg2: i32) -> (i32, i32, i32) {
    %c0_i32 = arith.constant 0 : i32
    %c0_i32_0 = arith.constant 0 : i32
    return %arg0, %c0_i32, %arg2 : i32, i32, i32
  }
  func.func @transform_1(%arg0: i32, %arg1: i32, %arg2: i32) -> (i32, i32, i32) {
    %c0_i32 = arith.constant 0 : i32
    %c0_i32_0 = arith.constant 0 : i32
    return %arg0, %c0_i32, %arg1 : i32, i32, i32
  }
  func.func @transform_2(%arg0: i32, %arg1: i32, %arg2: i32) -> (i32, i32, i32) {
    %c0_i32 = arith.constant 0 : i32
    %c0_i32_0 = arith.constant 0 : i32
    return %arg0, %c0_i32, %arg2 : i32, i32, i32
  }
  func.func @transform_3(%arg0: i32, %arg1: i32, %arg2: i32) -> (i32, i32, i32) {
    %c0_i32 = arith.constant 0 : i32
    %c0_i32_0 = arith.constant 0 : i32
    return %arg0, %c0_i32, %arg1 : i32, i32, i32
  }
  func.func @transform_4(%arg0: i32, %arg1: i32, %arg2: i32) -> (i32, i32, i32) {
    %c0_i32 = arith.constant 0 : i32
    %c0_i32_0 = arith.constant 0 : i32
    return %arg0, %c0_i32, %arg1 : i32, i32, i32
  }
}

</mosaic_0001>

<bundles_post_ra>
// kernel: memory_readout.1
= control target key start
LH: loop header
LB: loop body
LE: loop exit
PB: predicated region body
PF: predicated region fallthrough
CT: control target
= control target key end

     0   :  { %s1458_s15 = smov 0   ;;  %s1460_s16 = smov 0   ;;  %s1725_s0 = inlined_call_operand.vmem [shape: bf16[2,24,640], index: 0, kind: input, shape index: {}]   ;;  %s1726_s1 = inlined_call_operand.vmem [shape: bf16[2,24,256], index: 1, kind: input, shape index: {}]   ;;  %s1727_s2 = inlined_call_operand.vmem [shape: bf16[2,32,640], index: 2, kind: input, shape index: {}]   ;;  %s1728_s3 = inlined_call_operand.vmem [shape: f32[2,32,256], index: 3, kind: input, shape index: {}]   ;;  %s1729_s4 = inlined_call_operand.vmem [shape: f32[2,64,256], index: 4, kind: output, shape index: {}]  }
   0x1   :  { %s1462_s17 = smov 0   ;;  %s1464_s18 = smov 0  }
   0x2   :  { %s1466_s19 = smov 0   ;;  %s1468_s20 = smov 0  }
   0x3   :  { %s1470_s21 = smov 0   ;;  %s1472_s22 = smov 0  }
   0x4   :  { %s1474_s23 = smov 0   ;;  %s1476_s24 = smov 0  }
   0x5   :  { %s1478_s25 = smov 0  }
   0x6 LB: > { %s26_s26 = sadd.s32 1, %s1417_s22  ;;  %s29_s27 = sadd.s32 1, %s1421_s23  ;;  %s1429_s25 = sphi %s1478_s25, %s14_s25   ;;  %s1425_s24 = sphi %s1476_s24, %s1751_s24   ;;  %s1421_s23 = sphi %s1474_s23, %s1750_s23   ;;  %s1417_s22 = sphi %s1472_s22, %s1749_s22   ;;  %s1413_s21 = sphi %s1470_s21, %s1748_s21   ;;  %s1409_s20 = sphi %s1468_s20, %s1747_s20   ;;  %s1405_s19 = sphi %s1466_s19, %s1746_s19   ;;  %s1401_s18 = sphi %s1464_s18, %s1745_s18   ;;  %s1397_s17 = sphi %s1462_s17, %s1744_s17   ;;  %s1393_s16 = sphi %s1460_s16, %s1743_s16   ;;  %s1389_s15 = sphi %s1458_s15, %s1742_s15  }
   0x7   : > { %p27_p0 = scmp.ge.s32.totalorder %s26_s26, 5  ;;  %s33_s28 = sadd.s32 1, %s1425_s24 }
   0x8   : > { %p49_p1 = scmp.ne.s32.totalorder %s1401_s18, %s1397_s17  ;;  %p50_p3 = scmp.eq.s32.totalorder %s1429_s25, 0 }
   0x9   : > { %s1753_s26 = smov (%p27_p0, %s26_s26), 0  ;;  %s1755_s27 = smov (!%p27_p0, %s29_s27), %s1421_s23 }
   0xa   : > { %1733 = sst [smem:[#allocation10_spill]] %s1753_s26  ;;  %p31_p2 = scmp.ge.s32.totalorder %s1755_s27, 2 }
   0xb   : > { %s1106_s29 = sadd.s32 4294967295, %s1429_s25   ;;  %p77_p4 = scmp.ne.s32.totalorder %s1393_s16, %s1389_s15 }
   0xc   : > { %s1757_s27 = smov (%p31_p2, %s1755_s27), 0  ;;  %s1759_s28 = smov (!%p31_p2, %s33_s28), %s1425_s24 }
   0xd   : > { %1734 = sst [smem:[#allocation11_spill]] %s1757_s27  ;;  %s38_s30 = ssub.s32 %s1417_s22, %s1753_s26 }
   0xe   : > { %p1530_p5 = por %p50_p3, %p49_p1  ;;  %p35_p6 = scmp.ge.s32.totalorder %s1759_s28, 2 }
   0xf   : > { %p1534_p7 = por %p77_p4, %p50_p3  ;;  %s66_s7 = ssub.s32 %s1421_s23, %s1757_s27 }
  0x10   : > { %p165_p8 = scmp.eq.s32.totalorder %s1106_s29, 19  ;;  %s1761_s28 = smov (%p35_p6, %s1759_s28), 0 }
  0x11   : > { %1737 = sst [smem:[#allocation12_spill]] %s1761_s28  ;;  %s42_s8 = sadd.s32 1, %s1401_s18 }
  0x12   : > { %p1543_p9 = por %p165_p8, %p77_p4  ;;  %s37_s10 = ssub.s32 %s1425_s24, %s1761_s28 }
  0x13   : > { %s70_s11 = sadd.s32 1, %s1393_s16  ;;  %s39_s12 = sor.u32 %s38_s30, %s37_s10 }
  0x14   : > { %s67_s13 = sor.u32 %s66_s7, %s37_s10  ;;  %p40_p10 = scmp.eq.s32.totalorder %s39_s12, 0 }
  0x15   : > { %p68_p11 = scmp.eq.s32.totalorder %s67_s13, 0  ;;  %p1109_p12 = scmp.ge.s32.totalorder %s1429_s25, 20 }
  0x16   : > { %s1551_s14 = scalar_select %p40_p10, %s1401_s18, %s42_s8  }
  0x17   : > { %s1554_s26 = scalar_select %p68_p11, %s1393_s16, %s70_s11  }
  0x18   : > { %187 = sbr.rel (%p1109_p12) target bundleno = 66 (0x42), region = 16 }
  0x1f   : > { %190 = sbr.rel (!%p1530_p5) target bundleno = 40 (0x28), region = 20  ;;  %s192_s29 = sand.u32 (%p1530_p5), 1, %s1401_s18  }
  0x20   : > { %s1204_s28 = smul.u32 (%p1530_p5), 15, %s1425_s24 }
  0x21   : > { %s1203_s27 = smul.u32 (%p1530_p5), 12, %s192_s29 }
  0x22   : > { %s196_s30 = sadd.s32 (%p1530_p5), %s1417_s22, %s1204_s28 }
  0x23   : > { %s1110_s7 = sshll.u32 (%p1530_p5), %s196_s30, 2  ;;  %s194_s11 = scalar_lea.vmem (%p1530_p5), [#allocation5], %s1203_s27 }
  0x24   : > { %s198_s8 = scalar_lea.vmem (%p1530_p5), %s1725_s0, %s1110_s7 }
  0x25   : > { %v214_v0 = vld [vmem:[%s198_s8] sm:$0xf] (%p1530_p5)  ;;  %v216_v1 = vld [vmem:[%s198_s8 + $0x14] sm:$0xf] (%p1530_p5)  ;;  %v218_v2 = vld [vmem:[%s198_s8 + $0x28] sm:$0xf] (%p1530_p5) }
  0x26   : > { %215 = vst [vmem:[%s194_s11] sm:$0xf] %v214_v0  ;;  %217 = vst [vmem:[%s194_s11 + $0x4] sm:$0xf] %v216_v1 }
  0x27   : > { %219 = vst [vmem:[%s194_s11 + $0x8] sm:$0xf] %v218_v2 }
  0x28 PF: > { %248 = sbr.rel (!%p1534_p7) target bundleno = 49 (0x31), region = 61  ;;  %s250_s28 = sand.u32 (%p1534_p7), 1, %s1393_s16  }
  0x29   : > { %s1206_s13 = smul.u32 (%p1534_p7), 6, %s1425_s24 }
  0x2a   : > { %s1205_s29 = smul.u32 (%p1534_p7), 12, %s250_s28 }
  0x2b   : > { %s254_s30 = sadd.s32 (%p1534_p7), %s1421_s23, %s1206_s13 }
  0x2c   : > { %s1111_s10 = sshll.u32 (%p1534_p7), %s254_s30, 2  ;;  %s252_s27 = scalar_lea.vmem (%p1534_p7), [#allocation6], %s1205_s29 }
  0x2d   : > { %s256_s8 = scalar_lea.vmem (%p1534_p7), %s1726_s1, %s1111_s10 }
  0x2e   : > { %v272_v3 = vld [vmem:[%s256_s8] sm:$0xf] (%p1534_p7)  ;;  %v274_v4 = vld [vmem:[%s256_s8 + $0x8] sm:$0xf] (%p1534_p7)  ;;  %v276_v5 = vld [vmem:[%s256_s8 + $0x10] sm:$0xf] (%p1534_p7) }
  0x2f   : > { %273 = vst [vmem:[%s252_s27] sm:$0xf] %v272_v3  ;;  %275 = vst [vmem:[%s252_s27 + $0x4] sm:$0xf] %v274_v4 }
  0x30   : > { %277 = vst [vmem:[%s252_s27 + $0x8] sm:$0xf] %v276_v5 }
  0x31 PF: > { %306 = sbr.rel (!%p1530_p5) target bundleno = 58 (0x3a), region = 102  ;;  %s308_s11 = sand.u32 (%p1530_p5), 1, %s1401_s18  }
  0x32   : > { %s1207_s28 = smul.u32 (%p1530_p5), 20, %s1425_s24  ;;  %s1112_s13 = sshll.u32 (%p1530_p5), %s308_s11, 4 }
  0x33   : > { %s310_s29 = scalar_lea.vmem (%p1530_p5), [#allocation7], %s1112_s13 }
  0x34   : > { %s312_s30 = sadd.s32 (%p1530_p5), %s1417_s22, %s1207_s28 }
  0x35   : > { %s1113_s7 = sshll.u32 (%p1530_p5), %s312_s30, 2 }
  0x36   : > { %s314_s8 = scalar_lea.vmem (%p1530_p5), %s1727_s2, %s1113_s7 }
  0x37   : > { %v330_v6 = vld [vmem:[%s314_s8] sm:$0xf] (%p1530_p5)  ;;  %v332_v7 = vld [vmem:[%s314_s8 + $0x14] sm:$0xf] (%p1530_p5)  ;;  %v334_v8 = vld [vmem:[%s314_s8 + $0x28] sm:$0xf] (%p1530_p5) }
  0x38   : > { %331 = vst [vmem:[%s310_s29] sm:$0xf] %v330_v6  ;;  %333 = vst [vmem:[%s310_s29 + $0x4] sm:$0xf] %v332_v7  ;;  %v336_v9 = vld [vmem:[%s314_s8 + $0x3c] sm:$0xf] }
  0x39   : > { %335 = vst [vmem:[%s310_s29 + $0x8] sm:$0xf] %v334_v8  ;;  %337 = vst [vmem:[%s310_s29 + $0xc] sm:$0xf] %v336_v9 }
  0x3a PF: > { %368 = sbr.rel (!%p1534_p7) target bundleno = 66 (0x42), region = 143  ;;  %s370_s5 = sand.u32 (%p1534_p7), 1, %s1393_s16  }
  0x3b   : > { %s1115_s27 = sshll.u32 (%p1534_p7), %s1425_s24, 3  ;;  %s1114_s11 = sshll.u32 (%p1534_p7), %s370_s5, 5 }
  0x3c   : > { %s374_s28 = sadd.s32 (%p1534_p7), %s1421_s23, %s1115_s27  ;;  %s372_s12 = scalar_lea.vmem (%p1534_p7), [#allocation8], %s1114_s11 }
  0x3d   : > { %s1116_s30 = sshll.u32 (%p1534_p7), %s374_s28, 3 }
  0x3e   : > { %s376_s13 = scalar_lea.vmem (%p1534_p7), %s1728_s3, %s1116_s30 }
  0x3f   : > { %v410_v10 = vld [vmem:[%s376_s13] sm:$0xff] (%p1534_p7)  ;;  %v412_v11 = vld [vmem:[%s376_s13 + $0x10] sm:$0xff] (%p1534_p7) }
  0x40   : > { %v414_v12 = vld [vmem:[%s376_s13 + $0x20] sm:$0xff] (%p1534_p7)  ;;  %411 = vst [vmem:[%s372_s12] sm:$0xff] (%p1534_p7), %v410_v10  ;;  %413 = vst [vmem:[%s372_s12 + $0x8] sm:$0xff] (%p1534_p7), %v412_v11  ;;  %v416_v13 = vld [vmem:[%s376_s13 + $0x30] sm:$0xff] (%p1534_p7) }
  0x41   : > { %415 = vst [vmem:[%s372_s12 + $0x10] sm:$0xff] %v414_v12  ;;  %417 = vst [vmem:[%s372_s12 + $0x18] sm:$0xff] %v416_v13 }
  0x42 PF: > { %p1117_p13 = scmp.ge.s32.totalorder %s1429_s25, 1  ;;  %p422_p0 = scmp.lt.s32.totalorder %s1429_s25, 21 }
  0x44   : > { %p423_p1 = pnand %p1117_p13, %p422_p0 }
  0x45   : > { %s429_s6 = sand.u32 (!%p423_p1), 1, %s1397_s17   ;;  %s436_s8 = sand.u32 (!%p423_p1), 1, %s1389_s15  }
  0x46   : > { %426 = sbr.rel (%p423_p1) target bundleno = 741 (0x2e5), region = 181  ;;  %s1593_s5 = sshll.u32 (!%p423_p1), %s429_s6, 4 }
  0x47   : > { %s1208_s29 = smul.u32 (!%p423_p1), 12, %s429_s6  ;;  %s1119_s11 = sshll.u32 (!%p423_p1), %s436_s8, 5 }
  0x48   : > { %s1209_s27 = smul.u32 (!%p423_p1), 12, %s436_s8  ;;  %s1120_s28 = sshll.u32 (!%p423_p1), %s436_s8, 6 }
  0x49   : > { %s431_s30 = scalar_lea.vmem (!%p423_p1), [#allocation5], %s1208_s29  ;;  %s445_s10 = scalar_lea.vmem (!%p423_p1), [#allocation7], %s1593_s5 }
  0x4a   : > { %s438_s7 = scalar_lea.vmem (!%p423_p1), [#allocation6], %s1209_s27  ;;  %s1596_s13 = scalar_lea.vmem (!%p423_p1), [#allocation8], %s1119_s11 }
  0x4b   : > { %s1598_s12 = scalar_lea.vmem (!%p423_p1), [#allocation9], %s1120_s28  ;;  %p1121_p2 = scmp.ne.s32.totalorder (!%p423_p1), %s1405_s19, 0 }
  0x4d   : > { %490 = sbr.rel (%p1121_p2) target bundleno = 84 (0x54), region = 201  ;;  %v1431_v14 = vmov (!%p1121_p2), -inf   ;;  %v1432_v15 = vmov (!%p1121_p2), 0.0  }
  0x4e   : > { %491 = vst [vmem:[#allocation2] sm:$0x1] (!%p1121_p2), %v1431_v14  ;;  %492 = vst [vmem:[#allocation3] sm:$0x1] (!%p1121_p2), %v1432_v15 }
  0x4f   : > { %493 = vst [vmem:[#allocation4] sm:$0xff] (!%p1121_p2), %v1432_v15  ;;  %494 = vst [vmem:[#allocation4 + $0x8] sm:$0xff] (!%p1121_p2), %v1432_v15 }
  0x50   : > { %495 = vst [vmem:[#allocation4 + $0x10] sm:$0xff] (!%p1121_p2), %v1432_v15  ;;  %496 = vst [vmem:[#allocation4 + $0x18] sm:$0xff] (!%p1121_p2), %v1432_v15 }
  0x54 PF: > { %v1301_v16 = vld [vmem:[%s431_s30] sm:$0xff]   ;;  %v1302_v17 = vld [vmem:[%s431_s30 + $0x8] ss:$0 sps:$4 sm:$0xff]   ;;  %v1303_v18 = vld [vmem:[%s438_s7] sm:$0xff]   ;;  %vm563_vm0 = vcmask 1043456   ;;  %vm538_vm1 = vcmask 195584   ;;  %v691_v63 = vlaneseq }
  0x55   : > { %513 = vxpose.xlu0.c.b16.start [1/2] (short) %v1301_v16, 128  ;;  %v1304_v19 = vld [vmem:[%s438_s7 + $0x8] ss:$0 sps:$4 sm:$0xff]   ;;  %1162 = vmatprep.subr.bf16.mxu0 %v1303_v18  ;;  %v1305_v29 = vld [vmem:[%s445_s10] sm:$0xff]   ;;  %v664_v4 = vld [vmem:[#allocation2] sm:$0x1]  ;;  %p1136_p3 = scmp.ne.s32.totalorder %s1405_s19, 4 }
  0x56   : > { %1163 = vmatpush3.bf16.msra.mxu0 %v1303_v18  ;;  %v565_v20 = vsel %vm563_vm0, %v1304_v19, 0  ;;  %1198 = vmatprep.mubr.bf16.mxu1 %v1305_v29  ;;  %v692_v2 = vshrl.u32 %v691_v63, 7 }
  0x57   : > { %1202 = vmatprep.subr.msk.bf16.mxu0 %vm563_vm0, %v1304_v19 }
  0x58   : > { %v1638_v6 = vsub.s32 0, %v692_v2 }
  0x59   : > { %514 = vxpose.xlu0.c.b16.end [2/2] (short) %v1302_v17, 128 }
  0x5a   : > { %1165 = vmatpush3.bf16.msra.mxu0 %v565_v20 }
  0xbb   : > { %v521_v21 = vpop.trf.xlu0 }
  0xbc   : > { %1166 = vmatprep.mubr.msk.bf16.mxu0 %vm538_vm1, %v521_v21 }
  0xbf   : > { %v522_v22 = vpop.trf.xlu0 }
  0xc0   : > { %1167 = vmatmul.mubr.msk.bf16.vlgmr.msra.gmra.mrb[0].mxu0 %vm538_vm1, %v522_v22 }
  0xc3   : > { %v523_v23 = vpop.trf.xlu0 }
  0xc4   : > { %1170 = vmatprep.mubr.msk.bf16.mxu0 %vm538_vm1, %v523_v23 }
  0xc7   : > { %v524_v24 = vpop.trf.xlu0 }
  0xc8   : > { %1171 = vmatmul.mubr.msk.bf16.gmra.mrb[4].mxu0 %vm538_vm1, %v524_v24 }
  0xcb   : > { %v525_v25 = vpop.trf.xlu0 }
  0xcc   : > { %1174 = vmatprep.mubr.msk.bf16.mxu0 %vm538_vm1, %v525_v25 }
  0xcf   : > { %v526_v26 = vpop.trf.xlu0 }
  0xd0   : > { %1175 = vmatmul.mubr.msk.bf16.gmra.mrb[8].mxu0 %vm538_vm1, %v526_v26 }
  0xd3   : > { %v527_v27 = vpop.trf.xlu0 }
  0xd4   : > { %1178 = vmatprep.mubr.msk.bf16.mxu0 %vm538_vm1, %v527_v27 }
  0xd7   : > { %v528_v28 = vpop.trf.xlu0 }
  0xd8   : > { %1179 = vmatmul.mubr.msk.bf16.gmra.mrb[12].mxu0 %vm538_vm1, %v528_v28 }
 0x193   : > { %v1611_v30 = vpop.f32.mrb[0].mxu0 }
 0x194   : > { %v601_v31 = vpop.f32.mrb[1].mxu0 }
 0x195   : > { %v1613_v32 = vpop.f32.mrb[2].mxu0 }
 0x196   : > { %v604_v33 = vpop.f32.mrb[3].mxu0 }
 0x19b   : > { %v1615_v34 = vpop.f32.mrb[4].mxu0 }
 0x19c   : > { %v667_v35 = vmax.f32 %v1611_v30, %v1615_v34  ;;  %v617_v36 = vpop.f32.mrb[5].mxu0 }
 0x19d   : > { %v665_v37 = vmax.f32 %v601_v31, %v617_v36  ;;  %v1619_v38 = vpop.f32.mrb[6].mxu0 }
 0x19e   : > { %v668_v39 = vmax.f32 %v1613_v32, %v1619_v38  ;;  %v620_v40 = vpop.f32.mrb[7].mxu0 }
 0x19f   : > { %v666_v41 = vmax.f32 %v604_v33, %v620_v40 }
 0x1a3   : > { %v1623_v42 = vpop.f32.mrb[8].mxu0 }
 0x1a4   : > { %v671_v43 = vmax.f32 %v667_v35, %v1623_v42  ;;  %v633_v44 = vpop.f32.mrb[9].mxu0 }
 0x1a5   : > { %v669_v45 = vmax.f32 %v665_v37, %v633_v44  ;;  %v1626_v46 = vpop.f32.mrb[10].mxu0 }
 0x1a6   : > { %v672_v47 = vmax.f32 %v668_v39, %v1626_v46  ;;  %v636_v48 = vpop.f32.mrb[11].mxu0 }
 0x1a7   : > { %v670_v49 = vmax.f32 %v666_v41, %v636_v48 }
 0x1ab   : > { %v1629_v50 = vpop.f32.mrb[12].mxu0 }
 0x1ac   : > { %v675_v51 = vmax.f32 %v671_v43, %v1629_v50  ;;  %v1632_v52 = vpop.f32.mrb[13].mxu0 }
 0x1ad   : > { %v673_v53 = vmax.f32 %v669_v45, %v1632_v52  ;;  %v1635_v54 = vpop.f32.mrb[14].mxu0 }
 0x1ae   : > { %v676_v55 = vmax.f32 %v672_v47, %v1635_v54  ;;  %v652_v56 = vpop.f32.mrb[15].mxu0 }
 0x1af   : > { %v674_v57 = vmax.f32 %v670_v49, %v652_v56 }
 0x1b0   : > { %v678_v58 = vmax.f32 %v675_v51, %v676_v55 }
 0x1b1   : > { %v677_v59 = vmax.f32 %v673_v53, %v674_v57 }
 0x1b3   : > { %v679_v60 = vmax.f32 %v677_v59, %v678_v58 }
 0x1b5   : > { %v680_v61 = vrot.slane %v679_v60, 4 }
 0x1b7   : > { %v681_v62 = vmax.f32 %v679_v60, %v680_v61 }
 0x1b9   : > { %v682_v0 = vrot.slane %v681_v62, 2 }
 0x1bb   : > { %v683_v1 = vmax.f32 %v681_v62, %v682_v0 }
 0x1bd   : > { %v684_v3 = vrot.slane %v683_v1, 1 }
 0x1bf   : > { %v685_v5 = vmax.f32 %v683_v1, %v684_v3 }
 0x1c1   : > { %v686_v7 = vmax.f32 %v664_v4, %v685_v5 }
 0x1c3   : > { %v687_v8 = vsub.f32 %v664_v4, %v686_v7  ;;  %v694_v9 = vrot.slane %v686_v7, %v1638_v6  ;;  %864 = vst [vmem:[#allocation2] sm:$0x1] %v686_v7 }
 0x1c5   : > { %v688_v10 = vmul.f32 1.442695, %v687_v8  ;;  %v696_v11 = vsub.f32 %v601_v31, %v694_v9  ;;  %v697_v12 = vsub.f32 %v604_v33, %v694_v9  ;;  %v698_v13 = vsub.f32 %v1611_v30, %v694_v9 }
 0x1c6   : > { %v699_v14 = vsub.f32 %v1613_v32, %v694_v9  ;;  %v700_v15 = vsub.f32 %v617_v36, %v694_v9  ;;  %v701_v16 = vsub.f32 %v620_v40, %v694_v9  ;;  %v702_v17 = vsub.f32 %v1615_v34, %v694_v9 }
 0x1c7   : > { %1307 = vpow2.f32 %v688_v10  ;;  %v703_v18 = vsub.f32 %v1619_v38, %v694_v9  ;;  %v704_v19 = vsub.f32 %v633_v44, %v694_v9  ;;  %v705_v20 = vsub.f32 %v636_v48, %v694_v9 }
 0x1c8   : > { %v706_v21 = vsub.f32 %v1623_v42, %v694_v9  ;;  %v707_v22 = vsub.f32 %v1626_v46, %v694_v9  ;;  %v708_v23 = vsub.f32 %v1632_v52, %v694_v9  ;;  %v709_v24 = vsub.f32 %v652_v56, %v694_v9 }
 0x1c9   : > { %v710_v25 = vsub.f32 %v1629_v50, %v694_v9  ;;  %v712_v26 = vmul.f32 1.442695, %v696_v11  ;;  %v714_v27 = vmul.f32 1.442695, %v697_v12  ;;  %v716_v28 = vmul.f32 1.442695, %v698_v13 }
 0x1ca   : > { %v718_v29 = vmul.f32 1.442695, %v699_v14  ;;  %v711_v30 = vsub.f32 %v1635_v54, %v694_v9  ;;  %v720_v31 = vmul.f32 1.442695, %v700_v15  ;;  %v722_v32 = vmul.f32 1.442695, %v701_v16 }
 0x1cb   : > { %1309 = vpow2.f32 %v712_v26  ;;  %v724_v33 = vmul.f32 1.442695, %v702_v17  ;;  %v726_v34 = vmul.f32 1.442695, %v703_v18  ;;  %v728_v35 = vmul.f32 1.442695, %v704_v19 }
 0x1cc   : > { %1311 = vpow2.f32 %v714_v27  ;;  %v730_v36 = vmul.f32 1.442695, %v705_v20  ;;  %v732_v38 = vmul.f32 1.442695, %v706_v21  ;;  %v734_v39 = vmul.f32 1.442695, %v707_v22 }
 0x1cd   : > { %1313 = vpow2.f32 %v716_v28  ;;  %v736_v41 = vmul.f32 1.442695, %v708_v23  ;;  %v738_v42 = vmul.f32 1.442695, %v709_v24  ;;  %v740_v44 = vmul.f32 1.442695, %v710_v25 }
 0x1ce   : > { %1315 = vpow2.f32 %v718_v29  ;;  %v742_v46 = vmul.f32 1.442695, %v711_v30  ;;  %v1306_v22 = vld [vmem:[%s445_s10 + $0x8] sm:$0xff]  }
 0x1cf   : > { %1317 = vpow2.f32 %v720_v31  ;;  %v744_v26 = vld [vmem:[#allocation3] sm:$0x1]  ;;  %v771_v31 = vld [vmem:[#allocation4 + $0x10] sm:$0xff] }
 0x1d0   : > { %1319 = vpow2.f32 %v722_v32  ;;  %v769_v32 = vld [vmem:[#allocation4] sm:$0xff] }
 0x1d1   : > { %v1650_v37 = vpop.eup %1307  ;;  %1321 = vpow2.f32 %v724_v33  ;;  %v772_v33 = vld [vmem:[#allocation4 + $0x18] sm:$0xff] }
 0x1d2   : > { %1323 = vpow2.f32 %v726_v34  ;;  %v1654_v40 = vrot.slane %v1650_v37, %v1638_v6  ;;  %v745_v28 = vmul.f32 %v1650_v37, %v744_v26 }
 0x1d3   : > { %1325 = vpow2.f32 %v728_v35  ;;  %v770_v35 = vld [vmem:[#allocation4 + $0x8] sm:$0xff] }
 0x1d4   : > { %1327 = vpow2.f32 %v730_v36  ;;  %v781_v34 = vmul.f32 %v1654_v40, %v771_v31  ;;  %v780_v37 = vmul.f32 %v1654_v40, %v770_v35 }
 0x1d5   : > { %v1310_v43 = vpop.eup %1309  ;;  %1329 = vpow2.f32 %v732_v38  ;;  %v779_v38 = vmul.f32 %v1654_v40, %v769_v32 }
 0x1d6   : > { %v1312_v45 = vpop.eup %1311  ;;  %1331 = vpow2.f32 %v734_v39 }
 0x1d7   : > { %v1314_v47 = vpop.eup %1313  ;;  %1333 = vpow2.f32 %v736_v41  ;;  %v746_v48 = vadd.f32 %v1312_v45, %v1310_v43  ;;  %v787_v49 = vpack.c.bf16 %v1312_v45, %v1310_v43 }
 0x1d8   : > { %v1316_v50 = vpop.eup %1315  ;;  %1335 = vpow2.f32 %v738_v42  ;;  %v782_v42 = vmul.f32 %v1654_v40, %v772_v33  ;;  %v889_v40 = vld [vmem:[%s1596_s13] sm:$0xff] (!%p1136_p3) }
 0x1d9   : > { %v1318_v51 = vpop.eup %1317  ;;  %1337 = vpow2.f32 %v740_v44  ;;  %v747_v52 = vadd.f32 %v1314_v47, %v746_v48  ;;  %1182 = vmatprep.subr.bf16.mxu1 %v787_v49  ;;  %v788_v53 = vpack.c.bf16 %v1316_v50, %v1314_v47  ;;  %893 = vst [vmem:[%s1598_s12 + $0x20] sm:$0xff] (!%p1136_p3), %v889_v40 }
 0x1da   : > { %v1320_v54 = vpop.eup %1319  ;;  %1183 = vmatpush3.bf16.msra.mxu1 %v787_v49  ;;  %1339 = vpow2.f32 %v742_v46  ;;  %v890_v49 = vld [vmem:[%s1596_s13 + $0x8] sm:$0xff] (!%p1136_p3) }
 0x1db   : > { %v1322_v55 = vpop.eup %1321  ;;  %v748_v56 = vadd.f32 %v1316_v50, %v747_v52  ;;  %1184 = vmatprep.subr.bf16.mxu1 %v788_v53  ;;  %v789_v57 = vpack.c.bf16 %v1320_v54, %v1318_v51  ;;  %v891_v50 = vld [vmem:[%s1596_s13 + $0x10] sm:$0xff] (!%p1136_p3)  ;;  %894 = vst [vmem:[%s1598_s12 + $0x28] sm:$0xff] (!%p1136_p3), %v890_v49 }
 0x1dc   : > { %v1324_v58 = vpop.eup %1323  ;;  %895 = vst [vmem:[%s1598_s12 + $0x30] sm:$0xff] (!%p1136_p3), %v891_v50 }
 0x1dd   : > { %v1326_v59 = vpop.eup %1325  ;;  %v749_v60 = vadd.f32 %v1318_v51, %v748_v56  ;;  %v790_v61 = vpack.c.bf16 %v1324_v58, %v1322_v55  ;;  %v892_v51 = vld [vmem:[%s1596_s13 + $0x18] sm:$0xff] (!%p1136_p3) }
 0x1de   : > { %v1328_v62 = vpop.eup %1327  ;;  %1185 = vmatpush3.bf16.msra.mxu1 %v788_v53  ;;  %896 = vst [vmem:[%s1598_s12 + $0x38] sm:$0xff] (!%p1136_p3), %v892_v51 }
 0x1df   : > { %v1330_v63 = vpop.eup %1329  ;;  %v750_v0 = vadd.f32 %v1320_v54, %v749_v60  ;;  %1186 = vmatprep.subr.bf16.mxu1 %v789_v57  ;;  %v791_v1 = vpack.c.bf16 %v1328_v62, %v1326_v59 }
 0x1e0   : > { %v1332_v2 = vpop.eup %1331 }
 0x1e1   : > { %v1334_v3 = vpop.eup %1333  ;;  %v751_v4 = vadd.f32 %v1322_v55, %v750_v0  ;;  %v792_v5 = vpack.c.bf16 %v1332_v2, %v1330_v63 }
 0x1e2   : > { %v1336_v7 = vpop.eup %1335  ;;  %1187 = vmatpush3.bf16.msra.mxu1 %v789_v57 }
 0x1e3   : > { %v1338_v8 = vpop.eup %1337  ;;  %v752_v9 = vadd.f32 %v1324_v58, %v751_v4  ;;  %1188 = vmatprep.subr.bf16.mxu1 %v790_v61  ;;  %v793_v10 = vpack.c.bf16 %v1336_v7, %v1334_v3 }
 0x1e4   : > { %v1340_v11 = vpop.eup %1339 }
 0x1e5   : > { %v753_v12 = vadd.f32 %v1326_v59, %v752_v9  ;;  %v794_v13 = vpack.c.bf16 %v1340_v11, %v1338_v8 }
 0x1e6   : > { %1189 = vmatpush3.bf16.msra.mxu1 %v790_v61 }
 0x1e7   : > { %v754_v14 = vadd.f32 %v1328_v62, %v753_v12  ;;  %1190 = vmatprep.subr.bf16.mxu1 %v791_v1 }
 0x1e9   : > { %v755_v15 = vadd.f32 %v1330_v63, %v754_v14 }
 0x1ea   : > { %1191 = vmatpush3.bf16.msra.mxu1 %v791_v1 }
 0x1eb   : > { %v756_v16 = vadd.f32 %v1332_v2, %v755_v15  ;;  %1192 = vmatprep.subr.bf16.mxu1 %v792_v5 }
 0x1ed   : > { %v757_v17 = vadd.f32 %v1334_v3, %v756_v16 }
 0x1ee   : > { %1193 = vmatpush3.bf16.msra.mxu1 %v792_v5 }
 0x1ef   : > { %v758_v18 = vadd.f32 %v1336_v7, %v757_v17  ;;  %1194 = vmatprep.subr.bf16.mxu1 %v793_v10 }
 0x1f1   : > { %v759_v19 = vadd.f32 %v1338_v8, %v758_v18 }
 0x1f2   : > { %1195 = vmatpush3.bf16.msra.mxu1 %v793_v10 }
 0x1f3   : > { %v760_v20 = vadd.f32 %v1340_v11, %v759_v19  ;;  %1196 = vmatprep.subr.bf16.mxu1 %v794_v13 }
 0x1f5   : > { %v761_v21 = vrot.slane %v760_v20, 4 }
 0x1f6   : > { %1197 = vmatpush3.bf16.msra.mxu1 %v794_v13 }
 0x1f7   : > { %v762_v23 = vadd.f32 %v761_v21, %v760_v20 }
 0x1f9   : > { %v763_v24 = vrot.slane %v762_v23, 2  ;;  %1199 = vmatmul.mubr.bf16.vlgmr.msra.gmra.mrb[0].mxu1 %v1306_v22 }
 0x1fb   : > { %v764_v25 = vadd.f32 %v763_v24, %v762_v23 }
 0x1fd   : > { %v765_v27 = vrot.slane %v764_v25, 1 }
 0x1ff   : > { %v766_v29 = vadd.f32 %v765_v27, %v764_v25 }
 0x201   : > { %v767_v30 = vadd.f32 %v766_v29, %v745_v28 }
 0x203   : > { %768 = vst [vmem:[#allocation3] sm:$0x1] %v767_v30 }
 0x20a   : > { %v869_v48 = vld [vmem:[#allocation3] sm:$0x1] (!%p1136_p3) }
 0x20b   : > { %1341 = vrcp.f32 (!%p1136_p3), %v869_v48 }
 0x215   : > { %v1342_v53 = vpop.eup (!%p1136_p3), %1341 }
 0x216   : > { %v879_v57 = vrot.slane (!%p1136_p3), %v1342_v53, %v1638_v6 }
 0x2cc   : > { %v1200_v36 = vpop.f32.mrb[0].mxu1  ;;  %868 = sbr.rel (%p1136_p3) target bundleno = 733 (0x2dd), region = 205 }
 0x2cd   : > { %v858_v39 = vadd.f32 %v1200_v36, %v781_v34  ;;  %v841_v41 = vpop.f32.mrb[1].mxu1 }
 0x2ce   : > { %v856_v43 = vadd.f32 %v841_v41, %v779_v38  ;;  %v1201_v44 = vpop.f32.mrb[2].mxu1 }
 0x2cf   : > { %862 = vst [vmem:[#allocation4 + $0x10] sm:$0xff] %v858_v39  ;;  %v859_v45 = vadd.f32 %v1201_v44, %v782_v42  ;;  %v844_v46 = vpop.f32.mrb[3].mxu1 }
 0x2d0   : > { %860 = vst [vmem:[#allocation4] sm:$0xff] %v856_v43  ;;  %v857_v47 = vadd.f32 %v844_v46, %v780_v37 }
 0x2d1   : > { %863 = vst [vmem:[#allocation4 + $0x18] sm:$0xff] %v859_v45 }
 0x2d2   : > { %861 = vst [vmem:[#allocation4 + $0x8] sm:$0xff] %v857_v47 }
 0x2d6   : > { %v873_v55 = vld [vmem:[#allocation4 + $0x10] sm:$0xff] }
 0x2d7   : > { %v871_v52 = vld [vmem:[#allocation4] sm:$0xff]  ;;  %v883_v60 = vmul.f32 %v879_v57, %v873_v55 }
 0x2d8   : > { %v874_v56 = vld [vmem:[#allocation4 + $0x18] sm:$0xff]  ;;  %v881_v58 = vmul.f32 %v879_v57, %v871_v52 }
 0x2d9   : > { %v872_v54 = vld [vmem:[#allocation4 + $0x8] sm:$0xff]  ;;  %v884_v61 = vmul.f32 %v879_v57, %v874_v56  ;;  %887 = vst [vmem:[%s1598_s12 + $0x10] sm:$0xff] %v883_v60 }
 0x2da   : > { %v882_v59 = vmul.f32 %v879_v57, %v872_v54  ;;  %885 = vst [vmem:[%s1598_s12] sm:$0xff] %v881_v58 }
 0x2db   : > { %888 = vst [vmem:[%s1598_s12 + $0x18] sm:$0xff] %v884_v61 }
 0x2dc   : > { %886 = vst [vmem:[%s1598_s12 + $0x8] sm:$0xff] %v882_v59 }
 0x2dd PF: > { %903 = sbr.rel (!%p1543_p9) target bundleno = 741 (0x2e5), region = 209  ;;  %s1138_s15 = sshll.u32 (%p1543_p9), %s1413_s21, 4  ;;  %v957_v1 = vld [vmem:[%s1598_s12 + $0x20] sm:$0xff] (%p1543_p9)  ;;  %v959_v2 = vld [vmem:[%s1598_s12 + $0x28] sm:$0xff] (%p1543_p9)  ;;  %v961_v3 = vld [vmem:[%s1598_s12 + $0x30] sm:$0xff] (%p1543_p9) }
 0x2de   : > { %s905_s17 = sadd.s32 (%p1543_p9), %s1409_s20, %s1138_s15  ;;  %v963_v4 = vld [vmem:[%s1598_s12 + $0x38] sm:$0xff] (%p1543_p9) }
 0x2df   : > { %s1139_s19 = sshll.u32 (%p1543_p9), %s905_s17, 3 }
 0x2e0   : > { %v953_v63 = vld [vmem:[%s1598_s12 + $0x10] sm:$0xff] (%p1543_p9)  ;;  %s907_s8 = scalar_lea.vmem (%p1543_p9), %s1729_s4, %s1139_s19 }
 0x2e1   : > { %v949_v6 = vld [vmem:[%s1598_s12] sm:$0xff] (%p1543_p9)  ;;  %954 = vst [vmem:[%s907_s8 + $0x20] sm:$0xff] (%p1543_p9), %v953_v63  ;;  %958 = vst [vmem:[%s907_s8 + $0x40] sm:$0xff] (%p1543_p9), %v957_v1 }
 0x2e2   : > { %v955_v0 = vld [vmem:[%s1598_s12 + $0x18] sm:$0xff] (%p1543_p9)  ;;  %950 = vst [vmem:[%s907_s8] sm:$0xff] (%p1543_p9), %v949_v6  ;;  %960 = vst [vmem:[%s907_s8 + $0x50] sm:$0xff] (%p1543_p9), %v959_v2 }
 0x2e3   : > { %v951_v62 = vld [vmem:[%s1598_s12 + $0x8] sm:$0xff] (%p1543_p9)  ;;  %956 = vst [vmem:[%s907_s8 + $0x30] sm:$0xff] (%p1543_p9), %v955_v0  ;;  %962 = vst [vmem:[%s907_s8 + $0x60] sm:$0xff] (%p1543_p9), %v961_v3 }
 0x2e4   : > { %952 = vst [vmem:[%s907_s8 + $0x10] sm:$0xff] %v951_v62  ;;  %964 = vst [vmem:[%s907_s8 + $0x70] sm:$0xff] %v963_v4 }
 0x2e5 PF: > { %s14_s25 = sadd.s32 1, %s1429_s25   ;;  %s1739_s29 = sld [smem:[#allocation10_spill]] }
 0x2e6   : > { %p11_p4 = scmp.ge.s32.totalorder %s14_s25, 22   ;;  %s1740_s5 = sld [smem:[#allocation11_spill]] }
 0x2e7   : > { %s1741_s27 = sld [smem:[#allocation12_spill]]  ;;  %s1742_s15 = smov %s1393_s16 }
 0x2e8   : > { %s1743_s16 = smov %s1554_s26  ;;  %s1744_s17 = smov %s1401_s18 }
 0x2e9   : > { %s1745_s18 = smov %s1551_s14  ;;  %s1746_s19 = smov %s1417_s22 }
 0x2ea   : > { %s1747_s20 = smov %s1421_s23  ;;  %s1748_s21 = smov %s1425_s24 }
 0x2eb   : > { %s1749_s22 = smov %s1739_s29  ;;  %13 = sbr.rel (!%p11_p4) target bundleno = 6 (0x6), region = 302 }
 0x2ec   : > { %s1750_s23 = smov %s1740_s5 }
 0x2ed   : > { %s1751_s24 = smov %s1741_s27 }

</bundles_post_ra>
